<compile_context>
chip_gen: v6e
topology: v6e:2x2x1
jax: 0.10.0
libtpu: 0.0.40
codegen_flags: <defaults>
</compile_context>

<pallas_src>
import functools

import numpy as np
import jax
import jax.numpy as jnp
from jax import lax
from jax.experimental import pallas as pl
from jax.experimental.pallas import tpu as pltpu


def _ldam_tile_kernel(x_ref, tgt_ref, lt_ref, wt_ref, part_ref, *, s):
    x = x_ref[...].astype(jnp.float32)            # (T, C)  logits tile
    tgt = tgt_ref[...]                            # (T, 1)  int32 targets
    logit_t = lt_ref[...]                         # (T, 1)  s*(x[t] - delta[t])
    w_t = wt_ref[...]                             # (T, 1)  weight[target]

    t, c = x.shape
    onehot = lax.broadcasted_iota(jnp.int32, (t, c), 1) == tgt   # (T, C)

    # s * where(onehot, x - delta[target], x); the target column is replaced
    # directly by the pre-gathered scaled margin logit -> pure VPU, no gather.
    out = jnp.where(onehot, logit_t, x * jnp.float32(s))

    # Row-wise numerically-stable log-sum-exp.
    row_max = jnp.max(out, axis=-1, keepdims=True)
    sum_exp = jnp.sum(jnp.exp(out - row_max), axis=-1, keepdims=True)
    nll = row_max + jnp.log(sum_exp) - logit_t    # (T, 1)

    num = jnp.sum(nll * w_t)                      # weighted NLL partial sum
    den = jnp.sum(w_t)                            # weight partial sum

    # Lane-dense partial output: sublane 0 carries num, sublane 1 carries den.
    sub = lax.broadcasted_iota(jnp.int32, part_ref.shape, 1)     # (1, 8, 128)
    part_ref[...] = jnp.where(sub == 0, num,
                              jnp.where(sub == 1, den, jnp.float32(0.0)))


def _choose_tile_n(n, c, itemsize, x_tile_budget_bytes=4 * 1024 * 1024):
    """Pick a batch tile keeping one x tile within a few MiB of VMEM."""
    max_rows = max(8, x_tile_budget_bytes // max(1, c * itemsize))
    cap = min(2048, max_rows)
    if n <= cap:
        tile = ((n + 7) // 8) * 8                 # minimal padding for small N
    else:
        tile = (cap // 8) * 8
    return max(8, int(tile))


def ldam_loss(x, target, delta, weight=None, s=30.0):
    """x: (N, C) float logits, target: (N,) int, delta: (C,), weight: (C,) or None."""
    n, c = x.shape
    if weight is None:
        weight = jnp.ones((c,), jnp.float32)

    delta = delta.astype(jnp.float32)
    weight = weight.astype(jnp.float32)
    target = target.astype(jnp.int32)

    # Hoist per-row gathers out of the kernel (cheap O(N) gathers in JAX
    # replace an N x C masked XLU reduction per tile inside the kernel).
    x_t = jnp.take_along_axis(x.astype(jnp.float32), target[:, None], axis=1)  # (N,1)
    delta_t = jnp.take(delta, target)[:, None]                                  # (N,1)
    logit_t = jnp.float32(s) * (x_t - delta_t)                                   # (N,1)
    w_t = jnp.take(weight, target)[:, None]                                      # (N,1)
    tgt2 = target[:, None]                                                       # (N,1)

    tile_n = _choose_tile_n(n, c, jnp.dtype(x.dtype).itemsize)
    grid_n = pl.cdiv(n, tile_n)
    n_pad = grid_n * tile_n

    if n_pad != n:
        # Padded rows: weight 0 -> contribute nothing to num/den.
        pad = n_pad - n
        x = jnp.pad(x, ((0, pad), (0, 0)))
        tgt2 = jnp.pad(tgt2, ((0, pad), (0, 0)))
        logit_t = jnp.pad(logit_t, ((0, pad), (0, 0)))
        w_t = jnp.pad(w_t, ((0, pad), (0, 0)))

    kernel = functools.partial(_ldam_tile_kernel, s=float(s))
    partials = pl.pallas_call(
        kernel,
        out_shape=jax.ShapeDtypeStruct((grid_n, 8, 128), jnp.float32),
        grid_spec=pltpu.PrefetchScalarGridSpec(
            num_scalar_prefetch=0,
            grid=(grid_n,),
            in_specs=[
                pl.BlockSpec((tile_n, c), lambda i: (i, 0)),   # logits tile
                pl.BlockSpec((tile_n, 1), lambda i: (i, 0)),   # targets
                pl.BlockSpec((tile_n, 1), lambda i: (i, 0)),   # s*(x_t - delta_t)
                pl.BlockSpec((tile_n, 1), lambda i: (i, 0)),   # weight[target]
            ],
            out_specs=pl.BlockSpec((1, 8, 128), lambda i: (i, 0, 0)),
        ),
        compiler_params=pltpu.CompilerParams(
            dimension_semantics=("parallel",),
            vmem_limit_bytes=32 * 1024 * 1024,
        ),
    )(x, tgt2, logit_t, w_t)

    num = jnp.sum(partials[:, 0, 0])
    den = jnp.sum(partials[:, 1, 0])
    return num / den


def make_delta(class_num_list, max_m=0.5):
    cls = np.asarray(class_num_list, dtype=np.float64)
    delta = 1.0 / np.sqrt(np.sqrt(cls))
    delta = delta * (max_m / np.max(delta))
    return jnp.asarray(delta, dtype=jnp.float32)


def _ldam_ref(x, target, delta, weight, s):
    """Pure-JAX reference with the same semantics as the PyTorch module."""
    c = x.shape[1]
    onehot = jax.nn.one_hot(target, c, dtype=jnp.float32)
    batch_m = (onehot @ delta).reshape(-1, 1)
    out = s * jnp.where(onehot > 0, x - batch_m, x)
    logp = jax.nn.log_softmax(out, axis=-1)
    nll = -jnp.take_along_axis(logp, target[:, None], axis=1)[:, 0]
    w_t = weight[target]
    return jnp.sum(nll * w_t) / jnp.sum(w_t)


if __name__ == "__main__":
    key = jax.random.PRNGKey(0)
    C = 16                                        # num_classes

    # Deterministic "dataset" class frequencies and class weights.
    class_num_list = [200, 150, 120, 100, 90, 80, 70, 60,
                      50, 45, 40, 35, 30, 25, 20, 10]
    delta = make_delta(class_num_list, max_m=0.5)
    weight = jnp.asarray(np.linspace(0.5, 2.0, C, dtype=np.float32))

    # Case 1: aligned batch (no row padding).
    N = 8
    kx, kt, key = jax.random.split(key, 3)
    x = jax.random.normal(kx, (N, C), dtype=jnp.float32)
    target = jax.random.randint(kt, (N,), 0, C, dtype=jnp.int32)
    loss = ldam_loss(x, target, delta, weight=weight, s=30.0)
    jax.block_until_ready(loss)
    ref = _ldam_ref(x, target, delta, weight, 30.0)
    assert jnp.allclose(loss, ref, rtol=1e-5, atol=1e-5), (loss, ref)

    # Case 2: unaligned batch (exercises the row-padding path).
    N2 = 13
    kx2, kt2 = jax.random.split(key)
    x2 = jax.random.normal(kx2, (N2, C), dtype=jnp.float32)
    target2 = jax.random.randint(kt2, (N2,), 0, C, dtype=jnp.int32)
    loss2 = ldam_loss(x2, target2, delta, weight=weight, s=30.0)
    jax.block_until_ready(loss2)
    ref2 = _ldam_ref(x2, target2, delta, weight, 30.0)
    assert jnp.allclose(loss2, ref2, rtol=1e-5, atol=1e-5), (loss2, ref2)

    print("KERNEL_OK")
</pallas_src>

<mosaic_0001>
module attributes {stable_mosaic.version = 11 : i64} {
  func.func @_ldam_tile_kernel(%arg0: i32, %arg1: memref<8x16xf32, #tpu.memory_space<vmem>>, %arg2: memref<8x1xi32, #tpu.memory_space<vmem>>, %arg3: memref<8x1xf32, #tpu.memory_space<vmem>>, %arg4: memref<8x1xf32, #tpu.memory_space<vmem>>, %arg5: memref<1x8x128xf32, #tpu.memory_space<vmem>>) attributes {dimension_semantics = [#tpu.dimension_semantics<parallel>], iteration_bounds = array<i64: 1>, scalar_prefetch = 0 : i64, scratch_operands = 0 : i64, tpu.core_type = #tpu.core_type<tc>, window_params = [{transform_indices = @transform_0, window_bounds = array<i64: 8, 16>}, {transform_indices = @transform_1, window_bounds = array<i64: 8, 1>}, {transform_indices = @transform_2, window_bounds = array<i64: 8, 1>}, {transform_indices = @transform_3, window_bounds = array<i64: 8, 1>}, {transform_indices = @transform_4, window_bounds = array<i64: 1, 8, 128>}]} {
    %c0 = arith.constant 0 : index
    %c0_0 = arith.constant 0 : index
    %0 = vector.load %arg1[%c0, %c0_0] : memref<8x16xf32, #tpu.memory_space<vmem>>, vector<8x16xf32>
    %c0_1 = arith.constant 0 : index
    %c0_2 = arith.constant 0 : index
    %1 = vector.load %arg2[%c0_1, %c0_2] : memref<8x1xi32, #tpu.memory_space<vmem>>, vector<8x1xi32>
    %c0_3 = arith.constant 0 : index
    %c0_4 = arith.constant 0 : index
    %2 = vector.load %arg3[%c0_3, %c0_4] : memref<8x1xf32, #tpu.memory_space<vmem>>, vector<8x1xf32>
    %c0_5 = arith.constant 0 : index
    %c0_6 = arith.constant 0 : index
    %3 = vector.load %arg4[%c0_5, %c0_6] : memref<8x1xf32, #tpu.memory_space<vmem>>, vector<8x1xf32>
    %4 = tpu.iota {dimensions = array<i32: 1>} : vector<8x16xi32>
    %5 = vector.broadcast %1 : vector<8x1xi32> to vector<8x16xi32>
    %6 = arith.cmpi eq, %4, %5 : vector<8x16xi32>
    %cst = arith.constant 3.000000e+01 : f32
    %7 = vector.broadcast %cst : f32 to vector<8x16xf32>
    %8 = arith.mulf %0, %7 : vector<8x16xf32>
    %9 = vector.shape_cast %2 : vector<8x1xf32> to vector<8x1xf32>
    %10 = vector.broadcast %9 : vector<8x1xf32> to vector<8x16xf32>
    %11 = arith.select %6, %10, %8 : vector<8x16xi1>, vector<8x16xf32>
    %cst_7 = arith.constant dense<0xFF800000> : vector<8xf32>
    %12 = vector.multi_reduction <maximumf>, %11, %cst_7 [1] : vector<8x16xf32> to vector<8xf32>
    %13 = vector.shape_cast %12 : vector<8xf32> to vector<8x1xf32>
    %14 = vector.broadcast %13 : vector<8x1xf32> to vector<8x16xf32>
    %15 = arith.subf %11, %14 : vector<8x16xf32>
    %16 = math.exp %15 : vector<8x16xf32>
    %cst_8 = arith.constant dense<0.000000e+00> : vector<8xf32>
    %17 = vector.multi_reduction <add>, %16, %cst_8 [1] : vector<8x16xf32> to vector<8xf32>
    %18 = vector.shape_cast %17 : vector<8xf32> to vector<8x1xf32>
    %19 = math.log %18 : vector<8x1xf32>
    %20 = arith.addf %13, %19 : vector<8x1xf32>
    %21 = arith.subf %20, %2 : vector<8x1xf32>
    %22 = arith.mulf %21, %3 : vector<8x1xf32>
    %23 = vector.shape_cast %22 : vector<8x1xf32> to vector<1x8x1xf32>
    %cst_9 = arith.constant dense<0.000000e+00> : vector<1xf32>
    %24 = vector.multi_reduction <add>, %23, %cst_9 [1, 2] : vector<1x8x1xf32> to vector<1xf32>
    %25 = vector.shape_cast %24 : vector<1xf32> to vector<1x1x1xf32>
    %26 = vector.extract %25[0, 0, 0] : f32 from vector<1x1x1xf32>
    %27 = vector.shape_cast %3 : vector<8x1xf32> to vector<1x8x1xf32>
    %cst_10 = arith.constant dense<0.000000e+00> : vector<1xf32>
    %28 = vector.multi_reduction <add>, %27, %cst_10 [1, 2] : vector<1x8x1xf32> to vector<1xf32>
    %29 = vector.shape_cast %28 : vector<1xf32> to vector<1x1x1xf32>
    %30 = vector.extract %29[0, 0, 0] : f32 from vector<1x1x1xf32>
    %31 = tpu.iota {dimensions = array<i32: 1>} : vector<1x8x128xi32>
    %c0_i32 = arith.constant 0 : i32
    %32 = vector.broadcast %c0_i32 : i32 to vector<1x8x128xi32>
    %33 = arith.cmpi eq, %31, %32 : vector<1x8x128xi32>
    %c1_i32 = arith.constant 1 : i32
    %34 = vector.broadcast %c1_i32 : i32 to vector<1x8x128xi32>
    %35 = arith.cmpi eq, %31, %34 : vector<1x8x128xi32>
    %cst_11 = arith.constant 0.000000e+00 : f32
    %36 = vector.broadcast %30 : f32 to vector<1x8x128xf32>
    %37 = vector.broadcast %cst_11 : f32 to vector<1x8x128xf32>
    %38 = arith.select %35, %36, %37 : vector<1x8x128xi1>, vector<1x8x128xf32>
    %39 = vector.broadcast %26 : f32 to vector<1x8x128xf32>
    %40 = arith.select %33, %39, %38 : vector<1x8x128xi1>, vector<1x8x128xf32>
    %c0_12 = arith.constant 0 : index
    %c0_13 = arith.constant 0 : index
    %c0_14 = arith.constant 0 : index
    %41 = vector.load %arg5[%c0_12, %c0_13, %c0_14] : memref<1x8x128xf32, #tpu.memory_space<vmem>>, vector<1x8x128xf32>
    tpu.vector_store %arg5[%c0_12, %c0_13, %c0_14], %40 {strides = array<i32>} : memref<1x8x128xf32, #tpu.memory_space<vmem>>, vector<1x8x128xf32>,
    return
  }
  func.func @transform_0(%arg0: i32) -> (i32, i32) {
    %c0_i32 = arith.constant 0 : i32
    %c0_i32_0 = arith.constant 0 : i32
    return %arg0, %c0_i32 : i32, i32
  }
  func.func @transform_1(%arg0: i32) -> (i32, i32) {
    %c0_i32 = arith.constant 0 : i32
    %c0_i32_0 = arith.constant 0 : i32
    return %arg0, %c0_i32 : i32, i32
  }
  func.func @transform_2(%arg0: i32) -> (i32, i32) {
    %c0_i32 = arith.constant 0 : i32
    %c0_i32_0 = arith.constant 0 : i32
    return %arg0, %c0_i32 : i32, i32
  }
  func.func @transform_3(%arg0: i32) -> (i32, i32) {
    %c0_i32 = arith.constant 0 : i32
    %c0_i32_0 = arith.constant 0 : i32
    return %arg0, %c0_i32 : i32, i32
  }
  func.func @transform_4(%arg0: i32) -> (i32, i32, i32) {
    %c0_i32 = arith.constant 0 : i32
    %c0_i32_0 = arith.constant 0 : i32
    %c0_i32_1 = arith.constant 0 : i32
    return %arg0, %c0_i32, %c0_i32_0 : i32, i32, i32
  }
}

</mosaic_0001>

<bundles_post_ra>
// kernel: tpu_custom_call.1
= control target key start
LH: loop header
LB: loop body
LE: loop exit
PB: predicated region body
PF: predicated region fallthrough
CT: control target
= control target key end

     0   :  { %v127_v1 = vmov 0   ;;  %s169_s0 = inlined_call_operand.vmem [shape: f32[8,16], index: 0, kind: input, shape index: {}]   ;;  %s170_s1 = inlined_call_operand.vmem [shape: s32[8,1], index: 1, kind: input, shape index: {}]   ;;  %s171_s2 = inlined_call_operand.vmem [shape: f32[8,1], index: 2, kind: input, shape index: {}]   ;;  %s172_s3 = inlined_call_operand.vmem [shape: f32[8,1], index: 3, kind: input, shape index: {}]   ;;  %s173_s4 = inlined_call_operand.hbm [shape: f32[1,8,128], index: 4, kind: output, shape index: {}]  }
   0x1   :  { %v19_v0 = vld [vmem:[%s170_s1] sm:$0xff]  ;;  %100 = vset.pattern.permute.xlu0 %v127_v1 }
   0x2   :  { %9 = vsyncpa [#allocation3], 0  ;;  %25 = vperm.xlu0 %100, %v19_v0   ;;  %v20_v2 = vld [vmem:[%s171_s2] sm:$0xff]  ;;  %v22_v3 = vlaneseq  ;;  %vm35_vm0 = vcmask 130048   ;;  %vm50_vm2 = vcmask 7168  }
   0x3   :  { %v18_v4 = vld [vmem:[%s169_s0] sm:$0xff] }
   0x4   :  { %v23_v5 = vand.u32 127, %v22_v3  ;;  %v28_v7 = vmul.f32 30.0, %v18_v4  ;;  %v21_v16 = vld [vmem:[%s172_s3] sm:$0xff]  ;;  %v72_v39 = vshrl.u32 %v22_v3, 7  ;;  %s128_s3 = smov [#allocation2]  }
   0x5   :  { %v61_v17 = vsel %vm50_vm2, %v21_v16, 0.0  ;;  %s86_s21 = sshll.u32 %s128_s3, 4  ;;  %s87_s21 = int_to_ptr.vmem [resolvable:$true] %s86_s21 }
   0x6   :  { %31 = vperm.xlu0 %100, %v20_v2   ;;  %vm74_vm3 = vcmp.eq.s32.totalorder %v72_v39, 1  ;;  %vm73_vm4 = vcmp.eq.s32.totalorder %v72_v39, 0  ;;  %s105_s23 = scalar_lea.vmem %s87_s21, 128  ;;  %p110_p1 = scmp.lt.s32.totalorder %s87_s21, %s87_s21 }
   0x7   :  { %p106_p0 = scmp.ne.s32.totalorder %s87_s21, %s105_s23  ;;  %p111_p2 = scmp.lt.s32.totalorder %s105_s23, %s105_s23 }
   0x9   :  { %p112_p3 = por %p111_p2, %p110_p1 }
   0xb   :  { %p113_p4 = pnand %p112_p3, %p106_p0 }
  0x7d   :  { %v26_v6 = vpop.permute.xlu0 %25 }
  0x7e   :  { %vm27_vm1 = vcmp.eq.s32.totalorder %v23_v5, %v26_v6 }
  0x81   :  { %v32_v8 = vpop.permute.xlu0 %31 }
  0x82   :  { %v34_v9 = vsel %vm27_vm1, %v32_v8, %v28_v7 }
  0x83   :  { %v36_v10 = vsel %vm35_vm0, %v34_v9, -inf }
  0x84   :  { %37 = vmax.xlane.f32.xlu1 %v36_v10 }
 0x10d   :  { %v38_v11 = vpop.xlane.xlu1 %37 }
 0x10e   :  { %v39_v12 = vsub.f32 %v34_v9, %v38_v11 }
 0x110   :  { %v40_v13 = vmul.f32 1.442695, %v39_v12 }
 0x112   :  { %101 = vpow2.f32 %v40_v13 }
 0x11f   :  { %v102_v14 = vpop.eup %101 }
 0x120   :  { %v42_v15 = vsel %vm35_vm0, %v102_v14, 0.0 }
 0x121   :  { %43 = vadd.xlane.f32.xlu1 %v42_v15 }
 0x125   :  { %62 = vadd.xlane.f32.xlu1 %v61_v17 }
 0x1aa   :  { %v44_v18 = vpop.xlane.xlu1 %43 }
 0x1ab   :  { %103 = vlog2.f32 %v44_v18 }
 0x1ae   :  { %v63_v25 = vpop.xlane.xlu1 %62 }
 0x1af   :  { %v64_v26 = vrot.slane %v63_v25, 4 }
 0x1b1   :  { %v65_v27 = vadd.f32 %v64_v26, %v63_v25 }
 0x1b3   :  { %v66_v28 = vrot.slane %v65_v27, 2 }
 0x1b5   :  { %v67_v32 = vadd.f32 %v66_v28, %v65_v27 }
 0x1b7   :  { %v68_v35 = vrot.slane %v67_v32, 1 }
 0x1b8   :  { %v104_v19 = vpop.eup %103 }
 0x1b9   :  { %v46_v20 = vmul.f32 0.6931472, %v104_v19  ;;  %v69_v38 = vadd.f32 %v68_v35, %v67_v32 }
 0x1bb   :  { %v47_v21 = vadd.f32 %v46_v20, %v38_v11 }
 0x1bd   :  { %v48_v22 = vsub.f32 %v47_v21, %v20_v2 }
 0x1bf   :  { %v49_v23 = vmul.f32 %v48_v22, %v21_v16 }
 0x1c1   :  { %v51_v24 = vsel %vm50_vm2, %v49_v23, 0.0 }
 0x1c2   :  { %52 = vadd.xlane.f32.xlu0 %v51_v24 }
 0x24b   :  { %v53_v29 = vpop.xlane.xlu0 %52 }
 0x24c   :  { %v54_v30 = vrot.slane %v53_v29, 4 }
 0x24e   :  { %v55_v31 = vadd.f32 %v54_v30, %v53_v29 }
 0x250   :  { %v56_v33 = vrot.slane %v55_v31, 2 }
 0x252   :  { %v57_v34 = vadd.f32 %v56_v33, %v55_v31 }
 0x254   :  { %v58_v36 = vrot.slane %v57_v34, 1 }
 0x256   :  { %v59_v37 = vadd.f32 %v58_v36, %v57_v34 }
 0x258   :  { %94 = vpush %v59_v37 }
 0x259   :  { %96 = vpush %v69_v38 }
 0x289   :  { %s95_s0 = spop %94 }
 0x28a   :  { %v77_v40 = vstv %s95_s0  ;;  %s97_s22 = spop %96 }
 0x28b   :  { %v75_v41 = vstv %s97_s22 }
 0x28c   :  { %v76_v42 = vsel %vm74_vm3, %v75_v41, 0.0 }
 0x28d   :  { %v78_v43 = vsel %vm73_vm4, %v77_v40, %v76_v42 }
 0x28e   :  { %79 = vst [vmem:[#allocation2] sm:$0xff] %v78_v43 }
 0x28f   :  { %116 = shalt.err (!%p113_p4)
}
 0x290   :  { %89 = dma.vmem_to_hbm [thread:$0]  %s87_s21, 128, %s173_s4, [#allocation3]  }
 0x291   :  { %125 = dma.done.wait [#allocation3], 128  }
 0x292   :  { %126 = vsyncadd [#allocation3], 4294967168 }
 0x293   :  { %93 = vsyncpa [#allocation3], 1 }

</bundles_post_ra>
